<compile_context>
chip_gen: v6e
topology: v6e:2x2x1
jax: 0.10.0
libtpu: 0.0.40
codegen_flags: <defaults>
</compile_context>

<pallas_src>
import jax
import jax.numpy as jnp
from jax.experimental import pallas as pl
from jax.experimental.pallas import tpu as pltpu


def mlp_kernel(x_ref, w1t_ref, w2t_ref, w3t_ref, tail_ref, o_ref):
    x = x_ref[...]                                   # (TB, 70), input dtype

    tail = tail_ref[...]                             # (24, 8) f32 packed consts
    b1 = tail[:, 0:1]                                # (24, 1)
    b2 = tail[0:12, 1:2]                             # (12, 1)
    b3 = tail[0:6, 2:3]                              # (6, 1)
    w4 = tail[0:6, 3:4]                              # (6, 1)
    b4 = tail[0:1, 4:5]                              # (1, 1)

    # Layer 1: h1ᵀ = W1ᵀ·xᵀ via contraction of both lane axes (the q·kᵀ
    # pattern) — no explicit transpose of the (TB, 70) tile is needed.
    h = jax.lax.dot_general(w1t_ref[...], x, (((1,), (1,)), ((), ())),
                            preferred_element_type=jnp.float32)    # (24, TB)
    h = jnp.maximum(h + b1, 0.0)

    h = jnp.dot(w2t_ref[...], h.astype(w2t_ref.dtype),
                preferred_element_type=jnp.float32)                 # (12, TB)
    h = jnp.maximum(h + b2, 0.0)

    h = jnp.dot(w3t_ref[...], h.astype(w3t_ref.dtype),
                preferred_element_type=jnp.float32)                 # (6, TB)
    h = jnp.maximum(h + b3, 0.0)

    # Layer 4 (K=6, N=1): VPU multiply + sublane reduce; output is natively a
    # lane-dense (1, TB) row (no cross-lane relayout).
    y = jnp.sum(h * w4, axis=0, keepdims=True)                      # (1, TB)
    o_ref[...] = (y + b4).astype(o_ref.dtype)


def mlp_forward(x, params, *, tb=8192, x_buffer_count=2):
    """x: (B, 70). params: w1..w4 stored as (in, out), b1..b4 stored as (1, out).

    Returns (B, 1) float32, matching ModelTorch.forward semantics.
    x is passed to pallas_call untouched (no cast / pad copies through HBM).
    """
    B, F = x.shape
    assert F == 70, f"expected 70 input features, got {F}"
    dt = x.dtype

    # Tiny parameter repacks (negligible bytes; x itself is never copied).
    w1t = params["w1"].T.astype(dt)                  # (24, 70)
    w2t = params["w2"].T.astype(dt)                  # (12, 24)
    w3t = params["w3"].T.astype(dt)                  # (6, 12)

    def col(v, rows=24):
        v = jnp.asarray(v, jnp.float32).reshape(-1, 1)
        return jnp.pad(v, ((0, rows - v.shape[0]), (0, 0)))

    # One packed (24, 8) f32 array: [b1 | b2 | b3 | w4 | b4 | zero-pad]
    tail = jnp.concatenate(
        [col(params["b1"]), col(params["b2"]), col(params["b3"]),
         col(params["w4"]), col(params["b4"]), jnp.zeros((24, 3), jnp.float32)],
        axis=1)

    # Tile size: multiple of 128; clamp so we get >=2 grid tiles whenever B
    # allows it (v7x megacore: one tile per TensorCore at minimum).
    tb = max(128, (int(tb) // 128) * 128)
    tb = min(tb, max(128, pl.cdiv(B, 2 * 128) * 128))
    num_tiles = pl.cdiv(B, tb)
    b_pad = num_tiles * tb                            # output only; x NOT padded

    x_spec_kwargs = {}
    if x_buffer_count is not None and int(x_buffer_count) != 2:
        # v5e knob: deeper buffering of the only large HBM stream.
        x_spec_kwargs["pipeline_mode"] = pl.Buffered(int(x_buffer_count))

    in_specs = [
        pl.BlockSpec((tb, 70), lambda i: (i, 0), **x_spec_kwargs),
        pl.BlockSpec(w1t.shape, lambda i: (0, 0)),    # VMEM-resident
        pl.BlockSpec(w2t.shape, lambda i: (0, 0)),
        pl.BlockSpec(w3t.shape, lambda i: (0, 0)),
        pl.BlockSpec(tail.shape, lambda i: (0, 0)),
    ]
    out_spec = pl.BlockSpec((1, tb), lambda i: (0, i))   # lane-dense output row

    # Advisory cost for the XLA scheduler.
    flops = 2 * B * (70 * 24 + 24 * 12 + 12 * 6 + 6 * 1)
    w_bytes = sum(int(a.size) * a.dtype.itemsize for a in (w1t, w2t, w3t, tail))
    cost = pl.CostEstimate(flops=flops, transcendentals=0,
                           bytes_accessed=B * 70 * dt.itemsize + w_bytes + B * 4)

    # VMEM need: x window lane-pads to (tb, 128) and is N-buffered; the (1, tb)
    # output window sublane-pads to (8, tb) and is double-buffered; plus the
    # feature-major intermediates and fixed slack.  Only raise the scoped
    # limit when the 16 MiB default (v5e) would not fit; cap with headroom
    # well below v7x's 64 MiB physical VMEM.
    nbuf = max(2, int(x_buffer_count or 2))
    need = (nbuf * tb * 128 * dt.itemsize
            + 2 * 8 * tb * 4
            + 2 * w_bytes
            + 64 * tb * 4
            + (2 << 20))
    cp_kwargs = dict(dimension_semantics=("parallel",))
    if need > 16 * 1024 * 1024:
        cp_kwargs["vmem_limit_bytes"] = int(min(need, 48 * 1024 * 1024))

    out = pl.pallas_call(
        mlp_kernel,
        out_shape=jax.ShapeDtypeStruct((1, b_pad), jnp.float32),
        grid=(num_tiles,),
        in_specs=in_specs,
        out_specs=out_spec,
        compiler_params=pltpu.CompilerParams(**cp_kwargs),
        cost_estimate=cost,
    )(x, w1t, w2t, w3t, tail)

    # Rows >= B of the last (partial) tile are garbage and are sliced off here.
    return out[0, :B].reshape(B, 1)


def init_params(key):
    """Deterministic init mimicking PyTorch nn.Linear default U(-1/sqrt(fan_in), +)."""
    dims = [(70, 24), (24, 12), (12, 6), (6, 1)]
    params = {}
    for i, (fan_in, fan_out) in enumerate(dims, start=1):
        key, kw, kb = jax.random.split(key, 3)
        bound = 1.0 / (fan_in ** 0.5)
        # weight stored as (in, out) so the reference does x @ W
        params[f"w{i}"] = jax.random.uniform(
            kw, (fan_in, fan_out), jnp.float32, -bound, bound)
        params[f"b{i}"] = jax.random.uniform(
            kb, (1, fan_out), jnp.float32, -bound, bound)
    return params


if __name__ == "__main__":
    key = jax.random.PRNGKey(0)
    kx, kp = jax.random.split(key)

    B = 1000                       # not tile-aligned -> exercises the partial last block
    x = jax.random.normal(kx, (B, 70), jnp.float32)
    params = init_params(kp)

    out = jax.block_until_ready(mlp_forward(x, params))

    # plain-JAX float32 reference
    h = x
    for i in range(1, 4):
        h = jnp.maximum(
            jnp.dot(h, params[f"w{i}"], precision=jax.lax.Precision.HIGHEST)
            + params[f"b{i}"], 0.0)
    ref = jnp.dot(h, params["w4"],
                  precision=jax.lax.Precision.HIGHEST) + params["b4"]

    assert out.shape == (B, 1)
    assert jnp.allclose(out, ref, atol=1e-3, rtol=1e-3), float(
        jnp.max(jnp.abs(out - ref)))
    print("KERNEL_OK")
</pallas_src>

<mosaic_0001>
module attributes {stable_mosaic.version = 11 : i64} {
  func.func @mlp_kernel(%arg0: i32, %arg1: memref<512x70xf32, #tpu.memory_space<vmem>>, %arg2: memref<24x70xf32, #tpu.memory_space<vmem>>, %arg3: memref<12x24xf32, #tpu.memory_space<vmem>>, %arg4: memref<6x12xf32, #tpu.memory_space<vmem>>, %arg5: memref<24x8xf32, #tpu.memory_space<vmem>>, %arg6: memref<1x512xf32, #tpu.memory_space<vmem>>) attributes {dimension_semantics = [#tpu.dimension_semantics<parallel>], iteration_bounds = array<i64: 2>, scalar_prefetch = 0 : i64, scratch_operands = 0 : i64, tpu.core_type = #tpu.core_type<tc>, window_params = [{transform_indices = @transform_0, window_bounds = array<i64: 512, 70>}, {pipeline_mode = #tpu.pipeline_mode<synchronous>, transform_indices = @transform_1, window_bounds = array<i64: 24, 70>}, {pipeline_mode = #tpu.pipeline_mode<synchronous>, transform_indices = @transform_2, window_bounds = array<i64: 12, 24>}, {pipeline_mode = #tpu.pipeline_mode<synchronous>, transform_indices = @transform_3, window_bounds = array<i64: 6, 12>}, {pipeline_mode = #tpu.pipeline_mode<synchronous>, transform_indices = @transform_4, window_bounds = array<i64: 24, 8>}, {transform_indices = @transform_5, window_bounds = array<i64: 1, 512>}]} {
    %c0 = arith.constant 0 : index
    %c0_0 = arith.constant 0 : index
    %0 = vector.load %arg1[%c0, %c0_0] : memref<512x70xf32, #tpu.memory_space<vmem>>, vector<512x70xf32>
    %c0_1 = arith.constant 0 : index
    %c0_2 = arith.constant 0 : index
    %1 = vector.load %arg5[%c0_1, %c0_2] : memref<24x8xf32, #tpu.memory_space<vmem>>, vector<24x8xf32>
    %2 = vector.extract_strided_slice %1 {offsets = [0, 0], sizes = [24, 1], strides = [1, 1]} : vector<24x8xf32> to vector<24x1xf32>
    %3 = vector.extract_strided_slice %1 {offsets = [0, 1], sizes = [12, 1], strides = [1, 1]} : vector<24x8xf32> to vector<12x1xf32>
    %4 = vector.extract_strided_slice %1 {offsets = [0, 2], sizes = [6, 1], strides = [1, 1]} : vector<24x8xf32> to vector<6x1xf32>
    %5 = vector.extract_strided_slice %1 {offsets = [0, 3], sizes = [6, 1], strides = [1, 1]} : vector<24x8xf32> to vector<6x1xf32>
    %6 = vector.extract_strided_slice %1 {offsets = [0, 4], sizes = [1, 1], strides = [1, 1]} : vector<24x8xf32> to vector<1x1xf32>
    %c0_3 = arith.constant 0 : index
    %c0_4 = arith.constant 0 : index
    %7 = vector.load %arg2[%c0_3, %c0_4] : memref<24x70xf32, #tpu.memory_space<vmem>>, vector<24x70xf32>
    %cst = arith.constant dense<0.000000e+00> : vector<24x512xf32>
    %8 = tpu.matmul %7, %0, %cst {dimension_numbers = #tpu.dot_dimension_numbers<[1], [1], [0], [0], [0, 0, 1, 0], [], []>} : vector<24x70xf32>, vector<512x70xf32>, vector<24x512xf32> -> vector<24x512xf32>
    %9 = vector.broadcast %2 : vector<24x1xf32> to vector<24x512xf32>
    %10 = arith.addf %8, %9 : vector<24x512xf32>
    %cst_5 = arith.constant 0.000000e+00 : f32
    %11 = vector.broadcast %cst_5 : f32 to vector<24x512xf32>
    %12 = arith.maximumf %10, %11 : vector<24x512xf32>
    %c0_6 = arith.constant 0 : index
    %c0_7 = arith.constant 0 : index
    %13 = vector.load %arg3[%c0_6, %c0_7] : memref<12x24xf32, #tpu.memory_space<vmem>>, vector<12x24xf32>
    %cst_8 = arith.constant dense<0.000000e+00> : vector<12x512xf32>
    %14 = tpu.matmul %13, %12, %cst_8 {dimension_numbers = #tpu.dot_dimension_numbers<[1], [0], [0], [1], [0, 0, 1, 1], [], []>} : vector<12x24xf32>, vector<24x512xf32>, vector<12x512xf32> -> vector<12x512xf32>
    %15 = vector.broadcast %3 : vector<12x1xf32> to vector<12x512xf32>
    %16 = arith.addf %14, %15 : vector<12x512xf32>
    %cst_9 = arith.constant 0.000000e+00 : f32
    %17 = vector.broadcast %cst_9 : f32 to vector<12x512xf32>
    %18 = arith.maximumf %16, %17 : vector<12x512xf32>
    %c0_10 = arith.constant 0 : index
    %c0_11 = arith.constant 0 : index
    %19 = vector.load %arg4[%c0_10, %c0_11] : memref<6x12xf32, #tpu.memory_space<vmem>>, vector<6x12xf32>
    %cst_12 = arith.constant dense<0.000000e+00> : vector<6x512xf32>
    %20 = tpu.matmul %19, %18, %cst_12 {dimension_numbers = #tpu.dot_dimension_numbers<[1], [0], [0], [1], [0, 0, 1, 1], [], []>} : vector<6x12xf32>, vector<12x512xf32>, vector<6x512xf32> -> vector<6x512xf32>
    %21 = vector.broadcast %4 : vector<6x1xf32> to vector<6x512xf32>
    %22 = arith.addf %20, %21 : vector<6x512xf32>
    %cst_13 = arith.constant 0.000000e+00 : f32
    %23 = vector.broadcast %cst_13 : f32 to vector<6x512xf32>
    %24 = arith.maximumf %22, %23 : vector<6x512xf32>
    %25 = vector.broadcast %5 : vector<6x1xf32> to vector<6x512xf32>
    %26 = arith.mulf %24, %25 : vector<6x512xf32>
    %cst_14 = arith.constant dense<0.000000e+00> : vector<512xf32>
    %27 = vector.multi_reduction <add>, %26, %cst_14 [0] : vector<6x512xf32> to vector<512xf32>
    %28 = vector.shape_cast %27 : vector<512xf32> to vector<1x512xf32>
    %29 = vector.broadcast %6 : vector<1x1xf32> to vector<1x512xf32>
    %30 = arith.addf %28, %29 : vector<1x512xf32>
    %c0_15 = arith.constant 0 : index
    %c0_16 = arith.constant 0 : index
    %31 = vector.load %arg6[%c0_15, %c0_16] : memref<1x512xf32, #tpu.memory_space<vmem>>, vector<1x512xf32>
    tpu.vector_store %arg6[%c0_15, %c0_16], %30 {strides = array<i32>} : memref<1x512xf32, #tpu.memory_space<vmem>>, vector<1x512xf32>,
    return
  }
  func.func @transform_0(%arg0: i32) -> (i32, i32) {
    %c0_i32 = arith.constant 0 : i32
    %c0_i32_0 = arith.constant 0 : i32
    return %arg0, %c0_i32 : i32, i32
  }
  func.func @transform_1(%arg0: i32) -> (i32, i32) {
    %c0_i32 = arith.constant 0 : i32
    %c0_i32_0 = arith.constant 0 : i32
    %c0_i32_1 = arith.constant 0 : i32
    return %c0_i32, %c0_i32_0 : i32, i32
  }
  func.func @transform_2(%arg0: i32) -> (i32, i32) {
    %c0_i32 = arith.constant 0 : i32
    %c0_i32_0 = arith.constant 0 : i32
    %c0_i32_1 = arith.constant 0 : i32
    return %c0_i32, %c0_i32_0 : i32, i32
  }
  func.func @transform_3(%arg0: i32) -> (i32, i32) {
    %c0_i32 = arith.constant 0 : i32
    %c0_i32_0 = arith.constant 0 : i32
    %c0_i32_1 = arith.constant 0 : i32
    return %c0_i32, %c0_i32_0 : i32, i32
  }
  func.func @transform_4(%arg0: i32) -> (i32, i32) {
    %c0_i32 = arith.constant 0 : i32
    %c0_i32_0 = arith.constant 0 : i32
    %c0_i32_1 = arith.constant 0 : i32
    return %c0_i32, %c0_i32_0 : i32, i32
  }
  func.func @transform_5(%arg0: i32) -> (i32, i32) {
    %c0_i32 = arith.constant 0 : i32
    %c0_i32_0 = arith.constant 0 : i32
    return %c0_i32, %arg0 : i32, i32
  }
}

</mosaic_0001>

<bundles_post_ra>
// kernel: tpu_custom_call.1
= control target key start
LH: loop header
LB: loop body
LE: loop exit
PB: predicated region body
PF: predicated region fallthrough
CT: control target
= control target key end

     0   :  { %10 = vsyncpa [#allocation3], 0  ;;  %s1811_s0 = inlined_call_operand.vmem [shape: f32[1000,70], index: 0, kind: input, shape index: {}]   ;;  %s1812_s1 = inlined_call_operand.vmem [shape: f32[24,70], index: 1, kind: input, shape index: {}]   ;;  %s1813_s2 = inlined_call_operand.vmem [shape: f32[12,24], index: 2, kind: input, shape index: {}]   ;;  %s1814_s3 = inlined_call_operand.vmem [shape: f32[6,12], index: 3, kind: input, shape index: {}]   ;;  %s1815_s4 = inlined_call_operand.vmem [shape: f32[24,8], index: 4, kind: input, shape index: {}]   ;;  %s1816_s5 = inlined_call_operand.hbm [shape: f32[1,1024], index: 5, kind: output, shape index: {}]  }
   0x1   :  { %12 = vsyncpa [#allocation3 + $0x1], 0  ;;  %s1533_s18 = smov 0   ;;  %s1535_s19 = smov 0  }
   0x2   :  { %s1537_s20 = smov 0   ;;  %s1539_s21 = smov 0  }
   0x3 LB: > { %s1210_s22 = sadd.s32 4294967295, %s1493_s21   ;;  %s1211_s23 = sadd.s32 4294967294, %s1493_s21   ;;  %s1493_s21 = sphi %s1539_s21, %s1822_s21   ;;  %s1489_s20 = sphi %s1537_s20, %s1821_s20   ;;  %s1485_s19 = sphi %s1535_s19, %s1820_s19   ;;  %s1481_s18 = sphi %s1533_s18, %s1819_s18  }
   0x4   : > { %s1556_s24 = sadd.s32 1, %s1493_s21   ;;  %s135_s25 = sadd.s32 1, %s1489_s20 }
   0x5   : > { %s132_s26 = ssub.s32 %s1493_s21, %s1556_s24  ;;  %p145_p0 = scmp.ne.s32.totalorder %s1489_s20, %s1485_s19 }
   0x6   : > { %p133_p1 = scmp.eq.s32.totalorder %s132_s26, 0  ;;  %p146_p2 = scmp.eq.s32.totalorder %s1210_s22, 1 }
   0x7   : > { %p151_p3 = scmp.ne.s32.totalorder %s1485_s19, %s1481_s18  ;;  %p152_p4 = scmp.eq.s32.totalorder %s1211_s23, 1 }
   0x8   : > { %s1566_s27 = scalar_select %p133_p1, %s1489_s20, %s135_s25  }
   0x9   : > { %p1568_p5 = por %p146_p2, %p145_p0  ;;  %p1572_p6 = por %p152_p4, %p151_p3 }
   0xa   : > { %p1214_p7 = scmp.ge.s32.totalorder %s1493_s21, 1  ;;  %p199_p8 = scmp.lt.s32.totalorder %s1493_s21, 3 }
   0xc   : > { %p200_p9 = pnand %p1214_p7, %p199_p8 }
   0xd   : > { %s1578_s30 = sshll.u32 (!%p200_p9), %s1210_s22, 6  ;;  %s228_s13 = sand.u32 (!%p200_p9), 1, %s1485_s19  }
   0xe   : > { %203 = sbr.rel (%p200_p9) target bundleno = 747 (0x2eb), region = 40  ;;  %p236_p10 = scmp.lt.s32.totalorder (!%p200_p9), %s1578_s30, 124 }
   0xf   : > { %s1215_s14 = sshll.u32 (!%p200_p9), %s228_s13, 2  ;;  %s1150_s23 = scalar_lea.hbm (!%p200_p9), %s1816_s5, %s1578_s30 }
  0x10   : > { %s1138_s25 = scalar_lea.sflag (!%p200_p9), [#allocation3], %s228_s13  ;;  %s1502_s6 = smov (!%p200_p9), [#allocation2]  }
  0x11   : > { %s1437_s7 = sshll.u32 (!%p200_p9), %s1502_s6, 4  ;;  %s1438_s7 = int_to_ptr.vmem [resolvable:$false] %s1437_s7 }
  0x12   : > { %s1439_s8 = scalar_lea.vmem (!%p200_p9), %s1438_s7, 128 }
  0x13   : > { %vm331_vm0 = vcmask 572416   ;;  %v1583_v0 = vld [vmem:[%s1812_s1] sm:$0xff]  ;;  %v312_v1 = vld [vmem:[%s1815_s4 + $0x10] sm:$0xff]  ;;  %v1495_v3 = vmov 0   ;;  %s237_s12 = scalar_select %p236_p10, %s1578_s30, 124  ;;  %v1603_v4 = vld [vmem:[%s1815_s4 + $0x8] sm:$0xff] }
  0x14   : > { %1336 = vmatprep.mubr.msk.f32.mxu0 %vm331_vm0, %v1583_v0  ;;  %1374 = vmatprep.mubr.msk.f32.mxu1 %vm331_vm0, %v1583_v0  ;;  %v1596_v2 = vld [vmem:[%s1815_s4] sm:$0xff]  ;;  %vm721_vm1 = vcmask 195584   ;;  %vm899_vm2 = vcmask 1043456   ;;  %vm895_vm3 = vcmask 97280   ;;  %vm1066_vm4 = vcmask 1045504  }
  0x15   : > { %1427 = vset.pattern.permute.xlu1 %v1495_v3  ;;  %1426 = vset.pattern.permute.xlu0 %v1495_v3  ;;  %s1217_s15 = sshll.u32 %s237_s12, 3 }
  0x16   : > { %328 = vperm.xlu0 %1426, %v312_v1   ;;  %318 = vperm.xlu1 %1427, %v1596_v2   ;;  %s1608_s22 = scalar_lea.vmem %s1811_s0, %s1217_s15  ;;  %s230_s15 = scalar_lea.vmem [#allocation2], %s1215_s14 }
  0x17   : > { %v277_v5 = vld [vmem:[%s1608_s22 + $0xf8] sm:$0xff]  ;;  %v276_v9 = vld [vmem:[%s1608_s22 + $0xf0] sm:$0xff]  ;;  %v275_v13 = vld [vmem:[%s1608_s22 + $0xe8] sm:$0xff]  ;;  %s1152_s16 = sshll.u32 %s230_s15, 4  ;;  %s1153_s16 = int_to_ptr.vmem [resolvable:$true] %s1152_s16 }
  0x18   : > { %v309_v6 = vld [vmem:[%s1608_s22 + $0x1f8] sm:$0xff]  ;;  %1304 = vmatprep.subr.msk.mxu0 %vm331_vm0, %v277_v5  ;;  %v308_v10 = vld [vmem:[%s1608_s22 + $0x1f0] sm:$0xff]  ;;  %v307_v14 = vld [vmem:[%s1608_s22 + $0x1e8] sm:$0xff]  ;;  %s1433_s26 = scalar_lea.vmem %s1153_s16, 64  ;;  %p1440_p0 = scmp.lt.s32.totalorder %s1153_s16, %s1438_s7 }
  0x19   : > { %v261_v7 = vld [vmem:[%s1608_s22 + $0x78] sm:$0xff]  ;;  %1342 = vmatprep.subr.msk.mxu1 %vm331_vm0, %v309_v6  ;;  %v260_v11 = vld [vmem:[%s1608_s22 + $0x70] sm:$0xff]  ;;  %v259_v15 = vld [vmem:[%s1608_s22 + $0x68] sm:$0xff]  ;;  %p1434_p11 = scmp.ne.s32.totalorder %s1153_s16, %s1433_s26  ;;  %p1441_p1 = scmp.lt.s32.totalorder %s1439_s8, %s1433_s26 }
  0x1a   : > { %323 = vperm.xlu0 %1426, %v1603_v4   ;;  %v293_v8 = vld [vmem:[%s1608_s22 + $0x178] sm:$0xff]  ;;  %1305 = vmatpush3.xpose.msk.msra.mxu0 %vm331_vm0, %v261_v7  ;;  %v292_v12 = vld [vmem:[%s1608_s22 + $0x170] sm:$0xff]  ;;  %v291_v16 = vld [vmem:[%s1608_s22 + $0x168] sm:$0xff] }
  0x1b   : > { %1343 = vmatpush3.xpose.msk.msra.mxu1 %vm331_vm0, %v293_v8  ;;  %1306 = vmatprep.subr.msk.mxu0 %vm331_vm0, %v276_v9  ;;  %v274_v17 = vld [vmem:[%s1608_s22 + $0xe0] sm:$0xff]  ;;  %v273_v21 = vld [vmem:[%s1608_s22 + $0xd8] sm:$0xff]  ;;  %v272_v25 = vld [vmem:[%s1608_s22 + $0xd0] sm:$0xff]  ;;  %p1435_p12 = pnand %p1434_p11, %p1568_p5  ;;  %p1442_p2 = por %p1441_p1, %p1440_p0 }
  0x1c   : > { %1344 = vmatprep.subr.msk.mxu1 %vm331_vm0, %v308_v10  ;;  %v306_v18 = vld [vmem:[%s1608_s22 + $0x1e0] sm:$0xff]  ;;  %v305_v22 = vld [vmem:[%s1608_s22 + $0x1d8] sm:$0xff]  ;;  %v304_v26 = vld [vmem:[%s1608_s22 + $0x1d0] sm:$0xff]  ;;  %v1497_v10 = vmov 1  }
  0x1d   : > { %v258_v19 = vld [vmem:[%s1608_s22 + $0x60] sm:$0xff]  ;;  %v257_v23 = vld [vmem:[%s1608_s22 + $0x58] sm:$0xff]  ;;  %v256_v27 = vld [vmem:[%s1608_s22 + $0x50] sm:$0xff]  ;;  %1428 = vset.pattern.permute.xlu1 %v1497_v10  ;;  %p1436_p13 = pneg %p1435_p12 }
  0x1e   : > { %1307 = vmatpush3.xpose.msk.msra.mxu0 %vm331_vm0, %v260_v11  ;;  %v290_v20 = vld [vmem:[%s1608_s22 + $0x160] sm:$0xff]  ;;  %v289_v24 = vld [vmem:[%s1608_s22 + $0x158] sm:$0xff]  ;;  %v288_v28 = vld [vmem:[%s1608_s22 + $0x150] sm:$0xff]  ;;  %1429 = vset.pattern.permute.xlu0 %v1497_v10 }
  0x1f   : > { %1345 = vmatpush3.xpose.msk.msra.mxu1 %vm331_vm0, %v292_v12  ;;  %1308 = vmatprep.subr.msk.mxu0 %vm331_vm0, %v275_v13  ;;  %v271_v29 = vld [vmem:[%s1608_s22 + $0xc8] sm:$0xff]  ;;  %v270_v33 = vld [vmem:[%s1608_s22 + $0xc0] sm:$0xff]  ;;  %v269_v37 = vld [vmem:[%s1608_s22 + $0xb8] sm:$0xff]  ;;  %p1443_p3 = pnand %p1442_p2, %p1436_p13 }
  0x20   : > { %1346 = vmatprep.subr.msk.mxu1 %vm331_vm0, %v307_v14  ;;  %v303_v30 = vld [vmem:[%s1608_s22 + $0x1c8] sm:$0xff]  ;;  %v302_v34 = vld [vmem:[%s1608_s22 + $0x1c0] sm:$0xff]  ;;  %v301_v38 = vld [vmem:[%s1608_s22 + $0x1b8] sm:$0xff]  ;;  %714 = vperm.xlu0 %1429, %v1596_v2  }
  0x21   : > { %v255_v31 = vld [vmem:[%s1608_s22 + $0x48] sm:$0xff]  ;;  %v254_v35 = vld [vmem:[%s1608_s22 + $0x40] sm:$0xff]  ;;  %v253_v39 = vld [vmem:[%s1608_s22 + $0x38] sm:$0xff]  ;;  %718 = vperm.xlu1 %1428, %v1603_v4  }
  0x22   : > { %1309 = vmatpush3.xpose.msk.msra.mxu0 %vm331_vm0, %v259_v15  ;;  %v287_v32 = vld [vmem:[%s1608_s22 + $0x148] sm:$0xff]  ;;  %v286_v36 = vld [vmem:[%s1608_s22 + $0x140] sm:$0xff]  ;;  %v285_v40 = vld [vmem:[%s1608_s22 + $0x138] sm:$0xff] }
  0x23   : > { %1347 = vmatpush3.xpose.msk.msra.mxu1 %vm331_vm0, %v291_v16  ;;  %1310 = vmatprep.subr.msk.mxu0 %vm331_vm0, %v274_v17  ;;  %v268_v41 = vld [vmem:[%s1608_s22 + $0xb0] sm:$0xff]  ;;  %v267_v45 = vld [vmem:[%s1608_s22 + $0xa8] sm:$0xff]  ;;  %v266_v49 = vld [vmem:[%s1608_s22 + $0xa0] sm:$0xff] }
  0x24   : > { %1348 = vmatprep.subr.msk.mxu1 %vm331_vm0, %v306_v18  ;;  %v300_v42 = vld [vmem:[%s1608_s22 + $0x1b0] sm:$0xff]  ;;  %v299_v46 = vld [vmem:[%s1608_s22 + $0x1a8] sm:$0xff]  ;;  %v298_v50 = vld [vmem:[%s1608_s22 + $0x1a0] sm:$0xff] }
  0x25   : > { %v252_v43 = vld [vmem:[%s1608_s22 + $0x30] sm:$0xff]  ;;  %v251_v47 = vld [vmem:[%s1608_s22 + $0x28] sm:$0xff]  ;;  %v250_v51 = vld [vmem:[%s1608_s22 + $0x20] sm:$0xff] }
  0x26   : > { %1311 = vmatpush3.xpose.msk.msra.mxu0 %vm331_vm0, %v258_v19  ;;  %v284_v44 = vld [vmem:[%s1608_s22 + $0x130] sm:$0xff]  ;;  %v283_v48 = vld [vmem:[%s1608_s22 + $0x128] sm:$0xff]  ;;  %v282_v52 = vld [vmem:[%s1608_s22 + $0x120] sm:$0xff] }
  0x27   : > { %1349 = vmatpush3.xpose.msk.msra.mxu1 %vm331_vm0, %v290_v20  ;;  %1312 = vmatprep.subr.msk.mxu0 %vm331_vm0, %v273_v21  ;;  %v265_v53 = vld [vmem:[%s1608_s22 + $0x98] sm:$0xff]  ;;  %v264_v57 = vld [vmem:[%s1608_s22 + $0x90] sm:$0xff]  ;;  %v263_v61 = vld [vmem:[%s1608_s22 + $0x88] sm:$0xff] }
  0x28   : > { %1350 = vmatprep.subr.msk.mxu1 %vm331_vm0, %v305_v22  ;;  %v297_v54 = vld [vmem:[%s1608_s22 + $0x198] sm:$0xff]  ;;  %v296_v58 = vld [vmem:[%s1608_s22 + $0x190] sm:$0xff]  ;;  %v295_v62 = vld [vmem:[%s1608_s22 + $0x188] sm:$0xff] }
  0x29   : > { %v249_v55 = vld [vmem:[%s1608_s22 + $0x18] sm:$0xff]  ;;  %v248_v59 = vld [vmem:[%s1608_s22 + $0x10] sm:$0xff]  ;;  %v247_v63 = vld [vmem:[%s1608_s22 + $0x8] sm:$0xff] }
  0x2a   : > { %1313 = vmatpush3.xpose.msk.msra.mxu0 %vm331_vm0, %v257_v23  ;;  %v281_v56 = vld [vmem:[%s1608_s22 + $0x118] sm:$0xff]  ;;  %v280_v60 = vld [vmem:[%s1608_s22 + $0x110] sm:$0xff]  ;;  %v279_v1 = vld [vmem:[%s1608_s22 + $0x108] sm:$0xff] }
  0x2b   : > { %1351 = vmatpush3.xpose.msk.msra.mxu1 %vm331_vm0, %v289_v24  ;;  %1314 = vmatprep.subr.msk.mxu0 %vm331_vm0, %v272_v25  ;;  %v262_v3 = vld [vmem:[%s1608_s22 + $0x80] sm:$0xff]  ;;  %v314_v8 = vld [vmem:[%s1812_s1 + $0x8] sm:$0xff]  ;;  %v315_v9 = vld [vmem:[%s1812_s1 + $0x10] sm:$0xff] }
  0x2c   : > { %1352 = vmatprep.subr.msk.mxu1 %vm331_vm0, %v304_v26  ;;  %v294_v5 = vld [vmem:[%s1608_s22 + $0x180] sm:$0xff] }
  0x2d   : > { %v246_v6 = vld [vmem:[%s1608_s22] sm:$0xff] }
  0x2e   : > { %1315 = vmatpush3.xpose.msk.msra.mxu0 %vm331_vm0, %v256_v27  ;;  %v278_v7 = vld [vmem:[%s1608_s22 + $0x100] sm:$0xff] }
  0x2f   : > { %1353 = vmatpush3.xpose.msk.msra.mxu1 %vm331_vm0, %v288_v28  ;;  %1316 = vmatprep.subr.msk.mxu0 %vm331_vm0, %v271_v29 }
  0x30   : > { %1354 = vmatprep.subr.msk.mxu1 %vm331_vm0, %v303_v30 }
  0x32   : > { %1317 = vmatpush3.xpose.msk.msra.mxu0 %vm331_vm0, %v255_v31 }
  0x33   : > { %1355 = vmatpush3.xpose.msk.msra.mxu1 %vm331_vm0, %v287_v32  ;;  %1318 = vmatprep.subr.msk.mxu0 %vm331_vm0, %v270_v33 }
  0x34   : > { %1356 = vmatprep.subr.msk.mxu1 %vm331_vm0, %v302_v34 }
  0x36   : > { %1319 = vmatpush3.xpose.msk.msra.mxu0 %vm331_vm0, %v254_v35 }
  0x37   : > { %1357 = vmatpush3.xpose.msk.msra.mxu1 %vm331_vm0, %v286_v36  ;;  %1320 = vmatprep.subr.msk.mxu0 %vm331_vm0, %v269_v37 }
  0x38   : > { %1358 = vmatprep.subr.msk.mxu1 %vm331_vm0, %v301_v38 }
  0x3a   : > { %1321 = vmatpush3.xpose.msk.msra.mxu0 %vm331_vm0, %v253_v39 }
  0x3b   : > { %1359 = vmatpush3.xpose.msk.msra.mxu1 %vm331_vm0, %v285_v40  ;;  %1322 = vmatprep.subr.msk.mxu0 %vm331_vm0, %v268_v41 }
  0x3c   : > { %1360 = vmatprep.subr.msk.mxu1 %vm331_vm0, %v300_v42 }
  0x3e   : > { %1323 = vmatpush3.xpose.msk.msra.mxu0 %vm331_vm0, %v252_v43 }
  0x3f   : > { %1361 = vmatpush3.xpose.msk.msra.mxu1 %vm331_vm0, %v284_v44  ;;  %1324 = vmatprep.subr.msk.mxu0 %vm331_vm0, %v267_v45 }
  0x40   : > { %1362 = vmatprep.subr.msk.mxu1 %vm331_vm0, %v299_v46 }
  0x42   : > { %1325 = vmatpush3.xpose.msk.msra.mxu0 %vm331_vm0, %v251_v47 }
  0x43   : > { %1363 = vmatpush3.xpose.msk.msra.mxu1 %vm331_vm0, %v283_v48  ;;  %1326 = vmatprep.subr.msk.mxu0 %vm331_vm0, %v266_v49  ;;  %v711_v49 = vld [vmem:[%s1813_s2] sm:$0xff] }
  0x44   : > { %1364 = vmatprep.subr.msk.mxu1 %vm331_vm0, %v298_v50  ;;  %v712_v50 = vld [vmem:[%s1813_s2 + $0x8] sm:$0xf] }
  0x46   : > { %1327 = vmatpush3.xpose.msk.msra.mxu0 %vm331_vm0, %v250_v51  ;;  %v1498_v51 = vmov 2  }
  0x47   : > { %1365 = vmatpush3.xpose.msk.msra.mxu1 %vm331_vm0, %v282_v52  ;;  %1328 = vmatprep.subr.msk.mxu0 %vm331_vm0, %v265_v53  ;;  %v1499_v52 = vmov 4   ;;  %v1500_v53 = vmov 3  }
  0x48   : > { %1366 = vmatprep.subr.msk.mxu1 %vm331_vm0, %v297_v54  ;;  %1430 = vset.pattern.permute.xlu1 %v1498_v51  ;;  %v1112_v51 = vlaneseq }
  0x49   : > { %1432 = vset.pattern.permute.xlu0 %v1499_v52  ;;  %892 = vperm.xlu1 %1430, %v1596_v2  }
  0x4a   : > { %1329 = vmatpush3.xpose.msk.msra.mxu0 %vm331_vm0, %v249_v55  ;;  %1096 = vperm.xlu0 %1432, %v1596_v2   ;;  %vm1134_vm5 = vcmp.lt.s32.totalorder %v1112_v51, 512 }
  0x4b   : > { %1367 = vmatpush3.xpose.msk.msra.mxu1 %vm331_vm0, %v281_v56  ;;  %1330 = vmatprep.subr.msk.mxu0 %vm331_vm0, %v264_v57 }
  0x4c   : > { %1368 = vmatprep.subr.msk.mxu1 %vm331_vm0, %v296_v58 }
  0x4d   : > { %1431 = vset.pattern.permute.xlu1 %v1500_v53 }
  0x4e   : > { %1331 = vmatpush3.xpose.msk.msra.mxu0 %vm331_vm0, %v248_v59  ;;  %1059 = vperm.xlu1 %1431, %v1596_v2  }
  0x4f   : > { %1369 = vmatpush3.xpose.msk.msra.mxu1 %vm331_vm0, %v280_v60  ;;  %1332 = vmatprep.subr.msk.mxu0 %vm331_vm0, %v263_v61 }
  0x50   : > { %1370 = vmatprep.subr.msk.mxu1 %vm331_vm0, %v295_v62 }
  0x52   : > { %1333 = vmatpush3.xpose.msk.msra.mxu0 %vm331_vm0, %v247_v63 }
  0x53   : > { %1371 = vmatpush3.xpose.msk.msra.mxu1 %vm331_vm0, %v279_v1  ;;  %1334 = vmatprep.subr.msk.mxu0 %vm331_vm0, %v262_v3 }
  0x54   : > { %1372 = vmatprep.subr.msk.mxu1 %vm331_vm0, %v294_v5 }
  0x56   : > { %1335 = vmatpush3.xpose.msk.msra.mxu0 %vm331_vm0, %v246_v6 }
  0x57   : > { %1373 = vmatpush3.xpose.msk.msra.mxu1 %vm331_vm0, %v278_v7 }
  0x59   : > { %1337 = vmatmul.mubr.msk.f32.vlgmr.msra.gmra.mxu0 %vm331_vm0, %v1583_v0 }
  0x5a   : > { %1375 = vmatmul.mubr.msk.f32.vlgmr.msra.gmra.mxu1 %vm331_vm0, %v1583_v0  ;;  %1338 = vmatprep.mubr.msk.f32.mxu0 %vm331_vm0, %v314_v8  ;;  %v1496_v0 = vmov 0.0  }
  0x5b   : > { %1376 = vmatprep.mubr.msk.f32.mxu1 %vm331_vm0, %v314_v8 }
  0x5d   : > { %1339 = vmatmul.mubr.msk.f32.gmra.mxu0 %vm331_vm0, %v314_v8 }
  0x5e   : > { %1377 = vmatmul.mubr.msk.f32.gmra.mxu1 %vm331_vm0, %v314_v8  ;;  %1340 = vmatprep.mubr.msk.f32.mxu0 %vm331_vm0, %v315_v9 }
  0x5f   : > { %1378 = vmatprep.mubr.msk.f32.mxu1 %vm331_vm0, %v315_v9 }
  0x61   : > { %1341 = vmatmul.mubr.msk.f32.gmra.mxu0 %vm331_vm0, %v315_v9 }
  0x62   : > { %1379 = vmatmul.mubr.msk.f32.gmra.mxu1 %vm331_vm0, %v315_v9  ;;  %792 = vmatprep.mubr.f32.mxu0 %v1496_v0 }
  0x63   : > { %869 = vmatprep.mubr.f32.mxu1 %v1496_v0 }
  0x91   : > { %v329_v15 = vpop.permute.xlu0 %328  ;;  %v319_v27 = vpop.permute.xlu1 %318 }
  0x95   : > { %v324_v22 = vpop.permute.xlu0 %323 }
  0x9b   : > { %v715_v61 = vpop.permute.xlu0 %714 }
  0x9c   : > { %v719_v58 = vpop.permute.xlu1 %718 }
 0x119   : > { %v599_v11 = vpop.f32.mrf.mxu0 }
 0x11a   : > { %v682_v12 = vpop.f32.mrf.mxu1  ;;  %v600_v37 = vadd.f32 %v599_v11, %v319_v27 }
 0x11b   : > { %v601_v13 = vpop.f32.mrf.mxu0  ;;  %v683_v38 = vadd.f32 %v682_v12, %v319_v27 }
 0x11c   : > { %v684_v14 = vpop.f32.mrf.mxu1  ;;  %v602_v33 = vadd.f32 %v601_v13, %v319_v27  ;;  %v699_v47 = vmax.f32 %v600_v37, 0.0 }
 0x11d   : > { %v605_v16 = vpop.f32.mrf.mxu0  ;;  %v685_v34 = vadd.f32 %v684_v14, %v319_v27  ;;  %v701_v48 = vmax.f32 %v683_v38, 0.0 }
 0x11e   : > { %v688_v17 = vpop.f32.mrf.mxu1  ;;  %v606_v31 = vadd.f32 %v605_v16, %v324_v22  ;;  %v700_v45 = vmax.f32 %v602_v33, 0.0 }
 0x11f   : > { %v607_v18 = vpop.f32.mrf.mxu0  ;;  %v689_v32 = vadd.f32 %v688_v17, %v324_v22  ;;  %v702_v46 = vmax.f32 %v685_v34, 0.0  ;;  %v890_v17 = vld [vmem:[%s1814_s3] sm:$0x3f] }
 0x120   : > { %v690_v19 = vpop.f32.mrf.mxu1  ;;  %v608_v28 = vadd.f32 %v607_v18, %v324_v22  ;;  %v703_v43 = vmax.f32 %v606_v31, 0.0  ;;  %v893_v18 = vpop.permute.xlu1 %892 }
 0x121   : > { %v611_v20 = vpop.f32.mrf.mxu0  ;;  %v691_v29 = vadd.f32 %v690_v19, %v324_v22  ;;  %v705_v44 = vmax.f32 %v689_v32, 0.0 }
 0x122   : > { %v694_v21 = vpop.f32.mrf.mxu1  ;;  %v612_v23 = vadd.f32 %v611_v20, %v329_v15  ;;  %v704_v41 = vmax.f32 %v608_v28, 0.0 }
 0x123   : > { %v695_v24 = vadd.f32 %v694_v21, %v329_v15  ;;  %v613_v25 = vpop.f32.mrf.mxu0  ;;  %v706_v42 = vmax.f32 %v691_v29, 0.0 }
 0x124   : > { %v696_v26 = vpop.f32.mrf.mxu1  ;;  %v614_v4 = vadd.f32 %v613_v25, %v329_v15  ;;  %v707_v39 = vmax.f32 %v612_v23, 0.0  ;;  %v1060_v23 = vpop.permute.xlu1 %1059 }
 0x125   : > { %v697_v30 = vadd.f32 %v696_v26, %v329_v15  ;;  %v709_v40 = vmax.f32 %v695_v24, 0.0 }
 0x126   : > { %v708_v35 = vmax.f32 %v614_v4, 0.0 }
 0x127   : > { %v710_v36 = vmax.f32 %v697_v30, 0.0 }
 0x128   : > { %754 = vmatprep.subr.mxu0 %v708_v35 }
 0x129   : > { %831 = vmatprep.subr.mxu1 %v710_v36  ;;  %755 = vmatpush1.msra.mxu0 %v707_v39 }
 0x12a   : > { %832 = vmatpush1.msra.mxu1 %v709_v40  ;;  %756 = vmatprep.subr.mxu0 %v704_v41 }
 0x12b   : > { %833 = vmatprep.subr.mxu1 %v706_v42  ;;  %757 = vmatpush1.msra.mxu0 %v703_v43 }
 0x12c   : > { %834 = vmatpush1.msra.mxu1 %v705_v44  ;;  %758 = vmatprep.subr.mxu0 %v700_v45 }
 0x12d   : > { %835 = vmatprep.subr.mxu1 %v702_v46  ;;  %759 = vmatpush1.msra.mxu0 %v699_v47 }
 0x12e   : > { %836 = vmatpush1.msra.mxu1 %v701_v48  ;;  %1288 = vmatmul.mubr.msk.f32.vlgmr.msra.gmra.mxu0 %vm721_vm1, %v711_v49 }
 0x12f   : > { %1290 = vmatmul.mubr.msk.f32.vlgmr.msra.gmra.mxu1 %vm721_vm1, %v711_v49  ;;  %798 = vmatprep.mubr.f32.mxu0 %v1496_v0  ;;  %v1501_v49 = vmov 1966171168  }
 0x130   : > { %875 = vmatprep.mubr.f32.mxu1 %v1496_v0 }
 0x132   : > { %1289 = vmatmul.mubr.msk.f32.gmra.mxu0 %vm721_vm1, %v712_v50 }
 0x133   : > { %1291 = vmatmul.mubr.msk.f32.gmra.mxu1 %vm721_vm1, %v712_v50  ;;  %976 = vmatprep.mubr.f32.mxu0 %v1496_v0  ;;  %v1110_v50 = vunpack.c.l.s4 %v1501_v49 }
 0x134   : > { %1047 = vmatprep.mubr.f32.mxu1 %v1496_v0 }
 0x1ee   : > { %v794_v54 = vpop.f32.mrf.mxu0 }
 0x1ef   : > { %v871_v55 = vpop.f32.mrf.mxu1  ;;  %v795_v9 = vadd.f32 %v794_v54, %v715_v61 }
 0x1f0   : > { %v796_v56 = vpop.f32.mrf.mxu0  ;;  %v872_v0 = vadd.f32 %v871_v55, %v715_v61 }
 0x1f1   : > { %v873_v57 = vpop.f32.mrf.mxu1  ;;  %v797_v5 = vadd.f32 %v796_v56, %v715_v61  ;;  %v882_v15 = vmax.f32 %v795_v9, 0.0 }
 0x1f2   : > { %v800_v59 = vpop.f32.mrf.mxu0  ;;  %v874_v6 = vadd.f32 %v873_v57, %v715_v61  ;;  %v884_v16 = vmax.f32 %v872_v0, 0.0  ;;  %v1113_v61 = vshrl.u32 %v1112_v51, 7 }
 0x1f3   : > { %v877_v60 = vpop.f32.mrf.mxu1  ;;  %v801_v62 = vadd.f32 %v800_v59, %v719_v58  ;;  %v883_v13 = vmax.f32 %v797_v5, 0.0  ;;  %v1097_v5 = vpop.permute.xlu0 %1096 }
 0x1f4   : > { %v878_v63 = vadd.f32 %v877_v60, %v719_v58  ;;  %v802_v1 = vpop.f32.mrf.mxu0  ;;  %v885_v14 = vmax.f32 %v874_v6, 0.0  ;;  %v1111_v60 = vunpack.c.0.s8 %v1110_v50 }
 0x1f5   : > { %v879_v3 = vpop.f32.mrf.mxu1  ;;  %v803_v7 = vadd.f32 %v802_v1, %v719_v58  ;;  %v886_v11 = vmax.f32 %v801_v62, 0.0 }
 0x1f6   : > { %v880_v8 = vadd.f32 %v879_v3, %v719_v58  ;;  %v888_v12 = vmax.f32 %v878_v63, 0.0 }
 0x1f7   : > { %v887_v2 = vmax.f32 %v803_v7, 0.0 }
 0x1f8   : > { %v889_v10 = vmax.f32 %v880_v8, 0.0  ;;  %v1114_v8 = vsub.s32 %v1111_v60, %v1113_v61 }
 0x1f9   : > { %1292 = vmatprep.subr.msk.mxu0 %vm899_vm2, %v887_v2 }
 0x1fa   : > { %1295 = vmatprep.subr.msk.mxu1 %vm899_vm2, %v889_v10  ;;  %1293 = vmatpush1.msk.msra.mxu0 %vm899_vm2, %v886_v11 }
 0x1fb   : > { %1296 = vmatpush1.msk.msra.mxu1 %vm899_vm2, %v888_v12  ;;  %942 = vmatprep.subr.mxu0 %v883_v13 }
 0x1fc   : > { %1013 = vmatprep.subr.mxu1 %v885_v14  ;;  %943 = vmatpush1.msra.mxu0 %v882_v15 }
 0x1fd   : > { %1014 = vmatpush1.msra.mxu1 %v884_v16  ;;  %1294 = vmatmul.mubr.msk.f32.vlgmr.msra.gmra.mxu0 %vm895_vm3, %v890_v17 }
 0x1fe   : > { %1297 = vmatmul.mubr.msk.f32.vlgmr.msra.gmra.mxu1 %vm895_vm3, %v890_v17 }
 0x2bd   : > { %v978_v19 = vpop.f32.mrf.mxu0 }
 0x2be   : > { %v1049_v20 = vpop.f32.mrf.mxu1  ;;  %v979_v21 = vadd.f32 %v978_v19, %v893_v18 }
 0x2bf   : > { %v1050_v22 = vadd.f32 %v1049_v20, %v893_v18  ;;  %v980_v24 = vpop.f32.mrf.mxu0 }
 0x2c0   : > { %v1051_v25 = vpop.f32.mrf.mxu1  ;;  %v981_v26 = vadd.f32 %v980_v24, %v893_v18  ;;  %v1054_v28 = vmax.f32 %v979_v21, 0.0 }
 0x2c1   : > { %v1052_v27 = vadd.f32 %v1051_v25, %v893_v18  ;;  %v1056_v29 = vmax.f32 %v1050_v22, 0.0 }
 0x2c2   : > { %v1055_v4 = vmax.f32 %v981_v26, 0.0  ;;  %v1062_v31 = vmul.f32 %v1060_v23, %v1054_v28 }
 0x2c3   : > { %v1057_v30 = vmax.f32 %v1052_v27, 0.0  ;;  %v1064_v32 = vmul.f32 %v1060_v23, %v1056_v29 }
 0x2c4   : > { %v1063_v33 = vmul.f32 %v1060_v23, %v1055_v4  ;;  %v1067_v35 = vsel %vm1066_vm4, %v1062_v31, 0.0 }
 0x2c5   : > { %v1065_v34 = vmul.f32 %v1060_v23, %v1057_v30  ;;  %v1081_v36 = vsel %vm1066_vm4, %v1064_v32, 0.0  ;;  %v1068_v37 = vrot.slane %v1067_v35, 4 }
 0x2c6   : > { %v1082_v38 = vrot.slane %v1081_v36, 4  ;;  %v1074_v39 = vsel %vm1066_vm4, %v1063_v33, 0.0 }
 0x2c7   : > { %v1088_v40 = vsel %vm1066_vm4, %v1065_v34, 0.0  ;;  %v1069_v41 = vadd.f32 %v1068_v37, %v1067_v35  ;;  %v1075_v42 = vrot.slane %v1074_v39, 4 }
 0x2c8   : > { %v1083_v43 = vadd.f32 %v1082_v38, %v1081_v36  ;;  %v1089_v44 = vrot.slane %v1088_v40, 4 }
 0x2c9   : > { %v1070_v45 = vrot.slane %v1069_v41, 2  ;;  %v1076_v46 = vadd.f32 %v1075_v42, %v1074_v39 }
 0x2ca   : > { %v1084_v47 = vrot.slane %v1083_v43, 2  ;;  %v1090_v48 = vadd.f32 %v1089_v44, %v1088_v40 }
 0x2cb   : > { %v1077_v52 = vrot.slane %v1076_v46, 2  ;;  %v1071_v54 = vadd.f32 %v1070_v45, %v1069_v41 }
 0x2cc   : > { %v1091_v53 = vrot.slane %v1090_v48, 2  ;;  %v1085_v55 = vadd.f32 %v1084_v47, %v1083_v43 }
 0x2cd   : > { %v1072_v56 = vrot.slane %v1071_v54, 1  ;;  %v1078_v57 = vadd.f32 %v1077_v52, %v1076_v46 }
 0x2ce   : > { %v1086_v58 = vrot.slane %v1085_v55, 1  ;;  %v1092_v59 = vadd.f32 %v1091_v53, %v1090_v48 }
 0x2cf   : > { %v1073_v62 = vadd.f32 %v1072_v56, %v1071_v54  ;;  %v1079_v63 = vrot.slane %v1078_v57, 1 }
 0x2d0   : > { %v1087_v1 = vadd.f32 %v1086_v58, %v1085_v55  ;;  %v1093_v3 = vrot.slane %v1092_v59, 1 }
 0x2d1   : > { %v1080_v6 = vadd.f32 %v1079_v63, %v1078_v57  ;;  %v1099_v9 = vadd.f32 %v1097_v5, %v1073_v62 }
 0x2d2   : > { %v1094_v7 = vadd.f32 %v1093_v3, %v1092_v59  ;;  %v1101_v2 = vadd.f32 %v1097_v5, %v1087_v1 }
 0x2d3   : > { %v1100_v0 = vadd.f32 %v1097_v5, %v1080_v6 }
 0x2d4   : > { %v1102_v10 = vadd.f32 %v1097_v5, %v1094_v7 }
 0x2d5   : > { %v1107_v11 = vcombine.low %v1099_v9, %v1100_v0 }
 0x2d6   : > { %v1108_v12 = vcombine.low %v1101_v2, %v1102_v10 }
 0x2d7   : > { %v1115_v13 = vrot.slane %v1107_v11, %v1114_v8 }
 0x2d8   : > { %v1122_v14 = vrot.slane %v1108_v12, %v1114_v8 }
 0x2da   : > { %v1123_v15 = vcombine.low %v1115_v13, %v1122_v14 }
 0x2dc   : > { %v1130_v16 = vrot.slane %v1123_v15, %v1114_v8 }
 0x2de   : > { %1136 = vst.msk [vmem:[%s230_s15] sm:$0xf] %vm1134_vm5, %v1130_v16 }
 0x2df   : > { %1446 = shalt.err (!%p1443_p3)
}
 0x2e0   : > { %s1447_s9 = scalar_lea.hbm %s1150_s23, 64  ;;  %s1451_s11 = scalar_lea.hbm %s1816_s5, 128 }
 0x2e1   : > { %p1448_p4 = scmp.ne.s32.totalorder %s1150_s23, %s1447_s9  ;;  %p1452_p9 = scmp.lt.s32.totalorder %s1150_s23, %s1816_s5 }
 0x2e2   : > { %p1453_p10 = scmp.lt.s32.totalorder %s1451_s11, %s1447_s9 }
 0x2e3   : > { %p1449_p7 = pnand %p1448_p4, %p1568_p5 }
 0x2e4   : > { %p1454_p11 = por %p1453_p10, %p1452_p9 }
 0x2e5   : > { %p1450_p8 = pneg %p1449_p7 }
 0x2e7   : > { %p1455_p12 = pnand %p1454_p11, %p1450_p8 }
 0x2e9   : > { %1458 = shalt.err (!%p1455_p12)
}
 0x2ea   : > { %1380 = dma.vmem_to_hbm [thread:$0]  (%p1568_p5), %s1153_s16, 64, %s1150_s23, %s1138_s25  }
 0x2eb PF: > { %p1386_p13 = scmp.ge.s32.totalorder %s1493_s21, 2  ;;  %s1164_s14 = sand.u32 1, %s1481_s18  }
 0x2ec   : > { %s1165_s15 = scalar_lea.sflag [#allocation3], %s1164_s14 }
 0x2ed   : > { %p1383_p0 = pnand %p1386_p13, %p1572_p6 }
 0x2ef   : > { %p1384_p1 = pneg %p1383_p0 }
 0x2f1   : > { %1476 = dma.done.wait (%p1384_p1), %s1165_s15, 64  }
 0x2f2   : > { %1478 = vsyncadd (%p1384_p1), %s1165_s15, 4294967232  ;;  %p15_p2 = scmp.ge.s32.totalorder %s1556_s24, 4   ;;  %s1819_s18 = smov %s1485_s19 }
 0x2f3   : > { %s1820_s19 = smov %s1489_s20  ;;  %s1821_s20 = smov %s1566_s27 }
 0x2f4   : > { %s1822_s21 = smov %s1556_s24  ;;  %17 = sbr.rel (!%p15_p2) target bundleno = 3 (0x3), region = 75 }
 0x2f9   :  { %1170 = vsyncpa [#allocation3], 1 }
 0x2fa   :  { %1172 = vsyncpa [#allocation3 + $0x1], 1 }

</bundles_post_ra>
